<compile_context>
chip_gen: v7x
topology: tpu7x:2x2x1
jax: 0.10.0
libtpu: 0.0.40
codegen_flags: <defaults>
</compile_context>

<pallas_src>
import jax
import jax.numpy as jnp
from jax.experimental import pallas as pl
from jax.experimental.pallas import tpu as pltpu

_LANE = 128


def _planar_flow_kernel(z_ref, u_ref, w_ref, b_ref, z_out_ref, logdet_ref):
    """Run the full chain of K planar transforms on one latent vector.

    Shapes (all VMEM, float32):
      z_ref:      (1, Dpad)
      u_ref:      (K, Dpad)
      w_ref:      (K, Dpad)
      b_ref:      (K, 1)
      z_out_ref:  (1, Dpad)
      logdet_ref: (1, 1)
    """
    num_t = u_ref.shape[0]

    # u_k . w_k for every transform in one vectorized reduce (off the
    # sequential chain).  u . psi == (1 - tanh^2(inner)) * (u . w).
    uw = jnp.sum(u_ref[...] * w_ref[...], axis=-1, keepdims=True)   # (K, 1)

    z = z_ref[...].astype(jnp.float32)                               # (1, Dpad)
    ld = jnp.zeros((1, 1), dtype=jnp.float32)                        # (1, 1)

    # K is a small static trip count -> unroll the chain at trace time so all
    # row slices use static offsets.
    for k in range(num_t):
        w_k = w_ref[k:k + 1, :]                                      # (1, Dpad)
        u_k = u_ref[k:k + 1, :]                                      # (1, Dpad)
        b_k = b_ref[k:k + 1, :]                                      # (1, 1)

        # inner = w . z + b   (single cross-lane reduce on the chain -> XLU)
        inner = jnp.sum(w_k * z, axis=-1, keepdims=True) + b_k       # (1, 1)
        t = jnp.tanh(inner)                                          # (1, 1) EUP

        z = z + u_k * t                                              # (1, Dpad) VPU
        ld = ld + jnp.log(jnp.abs(1.0 + (1.0 - t * t) * uw[k:k + 1, :]))

    z_out_ref[...] = z.astype(z_out_ref.dtype)
    logdet_ref[...] = ld


@jax.jit
def propagate_flow_planar(z, u, w, b):
    """Forward of PropagateFlow('Planar', dim, K).

    z: (dim,) latent vector.
    u, w: (K, dim) planar-transform parameters.
    b: (K,) biases.
    Returns (z_out (dim,), logdet scalar).
    """
    dim = z.shape[-1]
    num_t = u.shape[0]

    # Lane-dense padding of the feature axis to a multiple of 128.
    dpad = max(_LANE, ((dim + _LANE - 1) // _LANE) * _LANE)
    pad = dpad - dim

    z2 = jnp.pad(z.astype(jnp.float32), (0, pad)).reshape(1, dpad)
    u2 = jnp.pad(u.astype(jnp.float32), ((0, 0), (0, pad)))
    w2 = jnp.pad(w.astype(jnp.float32), ((0, 0), (0, pad)))
    b2 = b.astype(jnp.float32).reshape(num_t, 1)

    vmem_spec = pl.BlockSpec(memory_space=pltpu.MemorySpace.VMEM)

    z_out_pad, logdet = pl.pallas_call(
        _planar_flow_kernel,
        out_shape=(
            jax.ShapeDtypeStruct((1, dpad), jnp.float32),
            jax.ShapeDtypeStruct((1, 1), jnp.float32),
        ),
        in_specs=[vmem_spec, vmem_spec, vmem_spec, vmem_spec],
        out_specs=(vmem_spec, vmem_spec),
    )(z2, u2, w2, b2)

    z_out = z_out_pad[0, :dim].astype(z.dtype)
    return z_out, logdet[0, 0]


def _planar_flow_reference(z, u, w, b):
    """Pure-JAX reference matching the PyTorch PropagateFlow('Planar')."""
    ld = jnp.float32(0.0)
    for k in range(u.shape[0]):
        inner = jnp.dot(w[k], z) + b[k]
        t = jnp.tanh(inner)
        z = z + u[k] * t
        psi = (1.0 - t * t) * w[k]
        ld = ld + jnp.log(jnp.abs(1.0 + jnp.dot(u[k], psi)))
    return z, ld


if __name__ == "__main__":
    key = jax.random.PRNGKey(0)
    dim = 32            # latent dimension
    num_transforms = 8  # length of the flow chain

    ku, kw, kb, kz = jax.random.split(key, 4)
    # parameter_init(-0.01, 0.01, ...) == uniform in [-0.01, 0.01]
    u = jax.random.uniform(ku, (num_transforms, dim), jnp.float32, -0.01, 0.01)
    w = jax.random.uniform(kw, (num_transforms, dim), jnp.float32, -0.01, 0.01)
    b = jax.random.uniform(kb, (num_transforms,), jnp.float32, -0.01, 0.01)
    z = jax.random.normal(kz, (dim,), dtype=jnp.float32)

    z_out, logdet = jax.block_until_ready(propagate_flow_planar(z, u, w, b))

    z_ref, ld_ref = _planar_flow_reference(z, u, w, b)

    assert z_out.shape == z.shape and z_out.dtype == z.dtype
    assert jnp.allclose(z_out, z_ref, atol=1e-6, rtol=1e-6), "z mismatch vs reference"
    assert jnp.allclose(logdet, ld_ref, atol=1e-6, rtol=1e-6), "logdet mismatch vs reference"

    print("KERNEL_OK")
</pallas_src>

<mosaic_0001>
module attributes {stable_mosaic.version = 11 : i64} {
  func.func @_planar_flow_kernel(%arg0: memref<1x128xf32, #tpu.memory_space<vmem>>, %arg1: memref<8x128xf32, #tpu.memory_space<vmem>>, %arg2: memref<8x128xf32, #tpu.memory_space<vmem>>, %arg3: memref<8x1xf32, #tpu.memory_space<vmem>>, %arg4: memref<1x128xf32, #tpu.memory_space<vmem>>, %arg5: memref<1x1xf32, #tpu.memory_space<vmem>>) attributes {dimension_semantics = [], scalar_prefetch = 0 : i64, scratch_operands = 0 : i64, tpu.core_type = #tpu.core_type<tc>} {
    %c0 = arith.constant 0 : index
    %c0_0 = arith.constant 0 : index
    %0 = vector.load %arg1[%c0, %c0_0] : memref<8x128xf32, #tpu.memory_space<vmem>>, vector<8x128xf32>
    %c0_1 = arith.constant 0 : index
    %c0_2 = arith.constant 0 : index
    %1 = vector.load %arg2[%c0_1, %c0_2] : memref<8x128xf32, #tpu.memory_space<vmem>>, vector<8x128xf32>
    %2 = arith.mulf %0, %1 : vector<8x128xf32>
    %cst = arith.constant dense<0.000000e+00> : vector<8xf32>
    %3 = vector.multi_reduction <add>, %2, %cst [1] : vector<8x128xf32> to vector<8xf32>
    %4 = vector.shape_cast %3 : vector<8xf32> to vector<8x1xf32>
    %c0_3 = arith.constant 0 : index
    %c0_4 = arith.constant 0 : index
    %5 = vector.load %arg0[%c0_3, %c0_4] : memref<1x128xf32, #tpu.memory_space<vmem>>, vector<1x128xf32>
    %cst_5 = arith.constant 0.000000e+00 : f32
    %6 = vector.broadcast %cst_5 : f32 to vector<1x1xf32>
    %c0_6 = arith.constant 0 : index
    %c0_7 = arith.constant 0 : index
    %7 = vector.load %arg2[%c0_6, %c0_7] : memref<8x128xf32, #tpu.memory_space<vmem>>, vector<1x128xf32>
    %c0_8 = arith.constant 0 : index
    %c0_9 = arith.constant 0 : index
    %8 = vector.load %arg1[%c0_8, %c0_9] : memref<8x128xf32, #tpu.memory_space<vmem>>, vector<1x128xf32>
    %c0_10 = arith.constant 0 : index
    %c0_11 = arith.constant 0 : index
    %9 = vector.load %arg3[%c0_10, %c0_11] : memref<8x1xf32, #tpu.memory_space<vmem>>, vector<1x1xf32>
    %10 = arith.mulf %7, %5 : vector<1x128xf32>
    %cst_12 = arith.constant dense<0.000000e+00> : vector<1xf32>
    %11 = vector.multi_reduction <add>, %10, %cst_12 [1] : vector<1x128xf32> to vector<1xf32>
    %12 = vector.shape_cast %11 : vector<1xf32> to vector<1x1xf32>
    %13 = arith.addf %12, %9 : vector<1x1xf32>
    %14 = math.tanh %13 : vector<1x1xf32>
    %15 = vector.broadcast %14 : vector<1x1xf32> to vector<1x128xf32>
    %16 = arith.mulf %8, %15 : vector<1x128xf32>
    %17 = arith.addf %5, %16 : vector<1x128xf32>
    %18 = arith.mulf %14, %14 : vector<1x1xf32>
    %cst_13 = arith.constant 1.000000e+00 : f32
    %19 = vector.broadcast %cst_13 : f32 to vector<1x1xf32>
    %20 = arith.subf %19, %18 : vector<1x1xf32>
    %21 = vector.extract_strided_slice %4 {offsets = [0, 0], sizes = [1, 1], strides = [1, 1]} : vector<8x1xf32> to vector<1x1xf32>
    %22 = arith.mulf %20, %21 : vector<1x1xf32>
    %cst_14 = arith.constant 1.000000e+00 : f32
    %23 = vector.broadcast %cst_14 : f32 to vector<1x1xf32>
    %24 = arith.addf %23, %22 : vector<1x1xf32>
    %25 = math.absf %24 : vector<1x1xf32>
    %26 = math.log %25 : vector<1x1xf32>
    %27 = arith.addf %6, %26 : vector<1x1xf32>
    %c1 = arith.constant 1 : index
    %c0_15 = arith.constant 0 : index
    %28 = vector.load %arg2[%c1, %c0_15] : memref<8x128xf32, #tpu.memory_space<vmem>>, vector<1x128xf32>
    %c1_16 = arith.constant 1 : index
    %c0_17 = arith.constant 0 : index
    %29 = vector.load %arg1[%c1_16, %c0_17] : memref<8x128xf32, #tpu.memory_space<vmem>>, vector<1x128xf32>
    %c1_18 = arith.constant 1 : index
    %c0_19 = arith.constant 0 : index
    %30 = vector.load %arg3[%c1_18, %c0_19] : memref<8x1xf32, #tpu.memory_space<vmem>>, vector<1x1xf32>
    %31 = arith.mulf %28, %17 : vector<1x128xf32>
    %cst_20 = arith.constant dense<0.000000e+00> : vector<1xf32>
    %32 = vector.multi_reduction <add>, %31, %cst_20 [1] : vector<1x128xf32> to vector<1xf32>
    %33 = vector.shape_cast %32 : vector<1xf32> to vector<1x1xf32>
    %34 = arith.addf %33, %30 : vector<1x1xf32>
    %35 = math.tanh %34 : vector<1x1xf32>
    %36 = vector.broadcast %35 : vector<1x1xf32> to vector<1x128xf32>
    %37 = arith.mulf %29, %36 : vector<1x128xf32>
    %38 = arith.addf %17, %37 : vector<1x128xf32>
    %39 = arith.mulf %35, %35 : vector<1x1xf32>
    %cst_21 = arith.constant 1.000000e+00 : f32
    %40 = vector.broadcast %cst_21 : f32 to vector<1x1xf32>
    %41 = arith.subf %40, %39 : vector<1x1xf32>
    %42 = vector.extract_strided_slice %4 {offsets = [1, 0], sizes = [1, 1], strides = [1, 1]} : vector<8x1xf32> to vector<1x1xf32>
    %43 = arith.mulf %41, %42 : vector<1x1xf32>
    %cst_22 = arith.constant 1.000000e+00 : f32
    %44 = vector.broadcast %cst_22 : f32 to vector<1x1xf32>
    %45 = arith.addf %44, %43 : vector<1x1xf32>
    %46 = math.absf %45 : vector<1x1xf32>
    %47 = math.log %46 : vector<1x1xf32>
    %48 = arith.addf %27, %47 : vector<1x1xf32>
    %c2 = arith.constant 2 : index
    %c0_23 = arith.constant 0 : index
    %49 = vector.load %arg2[%c2, %c0_23] : memref<8x128xf32, #tpu.memory_space<vmem>>, vector<1x128xf32>
    %c2_24 = arith.constant 2 : index
    %c0_25 = arith.constant 0 : index
    %50 = vector.load %arg1[%c2_24, %c0_25] : memref<8x128xf32, #tpu.memory_space<vmem>>, vector<1x128xf32>
    %c2_26 = arith.constant 2 : index
    %c0_27 = arith.constant 0 : index
    %51 = vector.load %arg3[%c2_26, %c0_27] : memref<8x1xf32, #tpu.memory_space<vmem>>, vector<1x1xf32>
    %52 = arith.mulf %49, %38 : vector<1x128xf32>
    %cst_28 = arith.constant dense<0.000000e+00> : vector<1xf32>
    %53 = vector.multi_reduction <add>, %52, %cst_28 [1] : vector<1x128xf32> to vector<1xf32>
    %54 = vector.shape_cast %53 : vector<1xf32> to vector<1x1xf32>
    %55 = arith.addf %54, %51 : vector<1x1xf32>
    %56 = math.tanh %55 : vector<1x1xf32>
    %57 = vector.broadcast %56 : vector<1x1xf32> to vector<1x128xf32>
    %58 = arith.mulf %50, %57 : vector<1x128xf32>
    %59 = arith.addf %38, %58 : vector<1x128xf32>
    %60 = arith.mulf %56, %56 : vector<1x1xf32>
    %cst_29 = arith.constant 1.000000e+00 : f32
    %61 = vector.broadcast %cst_29 : f32 to vector<1x1xf32>
    %62 = arith.subf %61, %60 : vector<1x1xf32>
    %63 = vector.extract_strided_slice %4 {offsets = [2, 0], sizes = [1, 1], strides = [1, 1]} : vector<8x1xf32> to vector<1x1xf32>
    %64 = arith.mulf %62, %63 : vector<1x1xf32>
    %cst_30 = arith.constant 1.000000e+00 : f32
    %65 = vector.broadcast %cst_30 : f32 to vector<1x1xf32>
    %66 = arith.addf %65, %64 : vector<1x1xf32>
    %67 = math.absf %66 : vector<1x1xf32>
    %68 = math.log %67 : vector<1x1xf32>
    %69 = arith.addf %48, %68 : vector<1x1xf32>
    %c3 = arith.constant 3 : index
    %c0_31 = arith.constant 0 : index
    %70 = vector.load %arg2[%c3, %c0_31] : memref<8x128xf32, #tpu.memory_space<vmem>>, vector<1x128xf32>
    %c3_32 = arith.constant 3 : index
    %c0_33 = arith.constant 0 : index
    %71 = vector.load %arg1[%c3_32, %c0_33] : memref<8x128xf32, #tpu.memory_space<vmem>>, vector<1x128xf32>
    %c3_34 = arith.constant 3 : index
    %c0_35 = arith.constant 0 : index
    %72 = vector.load %arg3[%c3_34, %c0_35] : memref<8x1xf32, #tpu.memory_space<vmem>>, vector<1x1xf32>
    %73 = arith.mulf %70, %59 : vector<1x128xf32>
    %cst_36 = arith.constant dense<0.000000e+00> : vector<1xf32>
    %74 = vector.multi_reduction <add>, %73, %cst_36 [1] : vector<1x128xf32> to vector<1xf32>
    %75 = vector.shape_cast %74 : vector<1xf32> to vector<1x1xf32>
    %76 = arith.addf %75, %72 : vector<1x1xf32>
    %77 = math.tanh %76 : vector<1x1xf32>
    %78 = vector.broadcast %77 : vector<1x1xf32> to vector<1x128xf32>
    %79 = arith.mulf %71, %78 : vector<1x128xf32>
    %80 = arith.addf %59, %79 : vector<1x128xf32>
    %81 = arith.mulf %77, %77 : vector<1x1xf32>
    %cst_37 = arith.constant 1.000000e+00 : f32
    %82 = vector.broadcast %cst_37 : f32 to vector<1x1xf32>
    %83 = arith.subf %82, %81 : vector<1x1xf32>
    %84 = vector.extract_strided_slice %4 {offsets = [3, 0], sizes = [1, 1], strides = [1, 1]} : vector<8x1xf32> to vector<1x1xf32>
    %85 = arith.mulf %83, %84 : vector<1x1xf32>
    %cst_38 = arith.constant 1.000000e+00 : f32
    %86 = vector.broadcast %cst_38 : f32 to vector<1x1xf32>
    %87 = arith.addf %86, %85 : vector<1x1xf32>
    %88 = math.absf %87 : vector<1x1xf32>
    %89 = math.log %88 : vector<1x1xf32>
    %90 = arith.addf %69, %89 : vector<1x1xf32>
    %c4 = arith.constant 4 : index
    %c0_39 = arith.constant 0 : index
    %91 = vector.load %arg2[%c4, %c0_39] : memref<8x128xf32, #tpu.memory_space<vmem>>, vector<1x128xf32>
    %c4_40 = arith.constant 4 : index
    %c0_41 = arith.constant 0 : index
    %92 = vector.load %arg1[%c4_40, %c0_41] : memref<8x128xf32, #tpu.memory_space<vmem>>, vector<1x128xf32>
    %c4_42 = arith.constant 4 : index
    %c0_43 = arith.constant 0 : index
    %93 = vector.load %arg3[%c4_42, %c0_43] : memref<8x1xf32, #tpu.memory_space<vmem>>, vector<1x1xf32>
    %94 = arith.mulf %91, %80 : vector<1x128xf32>
    %cst_44 = arith.constant dense<0.000000e+00> : vector<1xf32>
    %95 = vector.multi_reduction <add>, %94, %cst_44 [1] : vector<1x128xf32> to vector<1xf32>
    %96 = vector.shape_cast %95 : vector<1xf32> to vector<1x1xf32>
    %97 = arith.addf %96, %93 : vector<1x1xf32>
    %98 = math.tanh %97 : vector<1x1xf32>
    %99 = vector.broadcast %98 : vector<1x1xf32> to vector<1x128xf32>
    %100 = arith.mulf %92, %99 : vector<1x128xf32>
    %101 = arith.addf %80, %100 : vector<1x128xf32>
    %102 = arith.mulf %98, %98 : vector<1x1xf32>
    %cst_45 = arith.constant 1.000000e+00 : f32
    %103 = vector.broadcast %cst_45 : f32 to vector<1x1xf32>
    %104 = arith.subf %103, %102 : vector<1x1xf32>
    %105 = vector.extract_strided_slice %4 {offsets = [4, 0], sizes = [1, 1], strides = [1, 1]} : vector<8x1xf32> to vector<1x1xf32>
    %106 = arith.mulf %104, %105 : vector<1x1xf32>
    %cst_46 = arith.constant 1.000000e+00 : f32
    %107 = vector.broadcast %cst_46 : f32 to vector<1x1xf32>
    %108 = arith.addf %107, %106 : vector<1x1xf32>
    %109 = math.absf %108 : vector<1x1xf32>
    %110 = math.log %109 : vector<1x1xf32>
    %111 = arith.addf %90, %110 : vector<1x1xf32>
    %c5 = arith.constant 5 : index
    %c0_47 = arith.constant 0 : index
    %112 = vector.load %arg2[%c5, %c0_47] : memref<8x128xf32, #tpu.memory_space<vmem>>, vector<1x128xf32>
    %c5_48 = arith.constant 5 : index
    %c0_49 = arith.constant 0 : index
    %113 = vector.load %arg1[%c5_48, %c0_49] : memref<8x128xf32, #tpu.memory_space<vmem>>, vector<1x128xf32>
    %c5_50 = arith.constant 5 : index
    %c0_51 = arith.constant 0 : index
    %114 = vector.load %arg3[%c5_50, %c0_51] : memref<8x1xf32, #tpu.memory_space<vmem>>, vector<1x1xf32>
    %115 = arith.mulf %112, %101 : vector<1x128xf32>
    %cst_52 = arith.constant dense<0.000000e+00> : vector<1xf32>
    %116 = vector.multi_reduction <add>, %115, %cst_52 [1] : vector<1x128xf32> to vector<1xf32>
    %117 = vector.shape_cast %116 : vector<1xf32> to vector<1x1xf32>
    %118 = arith.addf %117, %114 : vector<1x1xf32>
    %119 = math.tanh %118 : vector<1x1xf32>
    %120 = vector.broadcast %119 : vector<1x1xf32> to vector<1x128xf32>
    %121 = arith.mulf %113, %120 : vector<1x128xf32>
    %122 = arith.addf %101, %121 : vector<1x128xf32>
    %123 = arith.mulf %119, %119 : vector<1x1xf32>
    %cst_53 = arith.constant 1.000000e+00 : f32
    %124 = vector.broadcast %cst_53 : f32 to vector<1x1xf32>
    %125 = arith.subf %124, %123 : vector<1x1xf32>
    %126 = vector.extract_strided_slice %4 {offsets = [5, 0], sizes = [1, 1], strides = [1, 1]} : vector<8x1xf32> to vector<1x1xf32>
    %127 = arith.mulf %125, %126 : vector<1x1xf32>
    %cst_54 = arith.constant 1.000000e+00 : f32
    %128 = vector.broadcast %cst_54 : f32 to vector<1x1xf32>
    %129 = arith.addf %128, %127 : vector<1x1xf32>
    %130 = math.absf %129 : vector<1x1xf32>
    %131 = math.log %130 : vector<1x1xf32>
    %132 = arith.addf %111, %131 : vector<1x1xf32>
    %c6 = arith.constant 6 : index
    %c0_55 = arith.constant 0 : index
    %133 = vector.load %arg2[%c6, %c0_55] : memref<8x128xf32, #tpu.memory_space<vmem>>, vector<1x128xf32>
    %c6_56 = arith.constant 6 : index
    %c0_57 = arith.constant 0 : index
    %134 = vector.load %arg1[%c6_56, %c0_57] : memref<8x128xf32, #tpu.memory_space<vmem>>, vector<1x128xf32>
    %c6_58 = arith.constant 6 : index
    %c0_59 = arith.constant 0 : index
    %135 = vector.load %arg3[%c6_58, %c0_59] : memref<8x1xf32, #tpu.memory_space<vmem>>, vector<1x1xf32>
    %136 = arith.mulf %133, %122 : vector<1x128xf32>
    %cst_60 = arith.constant dense<0.000000e+00> : vector<1xf32>
    %137 = vector.multi_reduction <add>, %136, %cst_60 [1] : vector<1x128xf32> to vector<1xf32>
    %138 = vector.shape_cast %137 : vector<1xf32> to vector<1x1xf32>
    %139 = arith.addf %138, %135 : vector<1x1xf32>
    %140 = math.tanh %139 : vector<1x1xf32>
    %141 = vector.broadcast %140 : vector<1x1xf32> to vector<1x128xf32>
    %142 = arith.mulf %134, %141 : vector<1x128xf32>
    %143 = arith.addf %122, %142 : vector<1x128xf32>
    %144 = arith.mulf %140, %140 : vector<1x1xf32>
    %cst_61 = arith.constant 1.000000e+00 : f32
    %145 = vector.broadcast %cst_61 : f32 to vector<1x1xf32>
    %146 = arith.subf %145, %144 : vector<1x1xf32>
    %147 = vector.extract_strided_slice %4 {offsets = [6, 0], sizes = [1, 1], strides = [1, 1]} : vector<8x1xf32> to vector<1x1xf32>
    %148 = arith.mulf %146, %147 : vector<1x1xf32>
    %cst_62 = arith.constant 1.000000e+00 : f32
    %149 = vector.broadcast %cst_62 : f32 to vector<1x1xf32>
    %150 = arith.addf %149, %148 : vector<1x1xf32>
    %151 = math.absf %150 : vector<1x1xf32>
    %152 = math.log %151 : vector<1x1xf32>
    %153 = arith.addf %132, %152 : vector<1x1xf32>
    %c7 = arith.constant 7 : index
    %c0_63 = arith.constant 0 : index
    %154 = vector.load %arg2[%c7, %c0_63] : memref<8x128xf32, #tpu.memory_space<vmem>>, vector<1x128xf32>
    %c7_64 = arith.constant 7 : index
    %c0_65 = arith.constant 0 : index
    %155 = vector.load %arg1[%c7_64, %c0_65] : memref<8x128xf32, #tpu.memory_space<vmem>>, vector<1x128xf32>
    %c7_66 = arith.constant 7 : index
    %c0_67 = arith.constant 0 : index
    %156 = vector.load %arg3[%c7_66, %c0_67] : memref<8x1xf32, #tpu.memory_space<vmem>>, vector<1x1xf32>
    %157 = arith.mulf %154, %143 : vector<1x128xf32>
    %cst_68 = arith.constant dense<0.000000e+00> : vector<1xf32>
    %158 = vector.multi_reduction <add>, %157, %cst_68 [1] : vector<1x128xf32> to vector<1xf32>
    %159 = vector.shape_cast %158 : vector<1xf32> to vector<1x1xf32>
    %160 = arith.addf %159, %156 : vector<1x1xf32>
    %161 = math.tanh %160 : vector<1x1xf32>
    %162 = vector.broadcast %161 : vector<1x1xf32> to vector<1x128xf32>
    %163 = arith.mulf %155, %162 : vector<1x128xf32>
    %164 = arith.addf %143, %163 : vector<1x128xf32>
    %165 = arith.mulf %161, %161 : vector<1x1xf32>
    %cst_69 = arith.constant 1.000000e+00 : f32
    %166 = vector.broadcast %cst_69 : f32 to vector<1x1xf32>
    %167 = arith.subf %166, %165 : vector<1x1xf32>
    %168 = vector.extract_strided_slice %4 {offsets = [7, 0], sizes = [1, 1], strides = [1, 1]} : vector<8x1xf32> to vector<1x1xf32>
    %169 = arith.mulf %167, %168 : vector<1x1xf32>
    %cst_70 = arith.constant 1.000000e+00 : f32
    %170 = vector.broadcast %cst_70 : f32 to vector<1x1xf32>
    %171 = arith.addf %170, %169 : vector<1x1xf32>
    %172 = math.absf %171 : vector<1x1xf32>
    %173 = math.log %172 : vector<1x1xf32>
    %174 = arith.addf %153, %173 : vector<1x1xf32>
    %c0_71 = arith.constant 0 : index
    %c0_72 = arith.constant 0 : index
    %175 = vector.load %arg4[%c0_71, %c0_72] : memref<1x128xf32, #tpu.memory_space<vmem>>, vector<1x128xf32>
    tpu.vector_store %arg4[%c0_71, %c0_72], %164 {strides = array<i32>} : memref<1x128xf32, #tpu.memory_space<vmem>>, vector<1x128xf32>,
    %c0_73 = arith.constant 0 : index
    %c0_74 = arith.constant 0 : index
    %176 = vector.load %arg5[%c0_73, %c0_74] : memref<1x1xf32, #tpu.memory_space<vmem>>, vector<1x1xf32>
    tpu.vector_store %arg5[%c0_73, %c0_74], %174 {strides = array<i32>} : memref<1x1xf32, #tpu.memory_space<vmem>>, vector<1x1xf32>,
    return
  }
}

</mosaic_0001>

<bundles_post_ra>
// kernel: propagate_flow_planar.1
= control target key start
LH: loop header
LB: loop body
LE: loop exit
PB: predicated region body
PF: predicated region fallthrough
CT: control target
= control target key end

     0   :  { %vm30_vm0 = vcmask 1040384   ;;  %s475_s0 = inlined_call_operand.vmem [shape: f32[1,128], index: 0, kind: input, shape index: {}]   ;;  %s476_s1 = inlined_call_operand.vmem [shape: f32[8,128], index: 1, kind: input, shape index: {}]   ;;  %s477_s2 = inlined_call_operand.vmem [shape: f32[8,128], index: 2, kind: input, shape index: {}]   ;;  %s478_s3 = inlined_call_operand.vmem [shape: f32[8,1], index: 3, kind: input, shape index: {}]   ;;  %s479_s4 = inlined_call_operand.vmem [shape: f32[1,128], index: 4, kind: output, shape index: {0}]   ;;  %s480_s5 = inlined_call_operand.hbm [shape: f32[1,1], index: 5, kind: output, shape index: {1}]  }
   0x1   :  { %v25_v0 = vld [vmem:[%s475_s0] sm:$0x1] }
   0x2   :  { %v26_v1 = vld [vmem:[%s477_s2] sm:$0x1] }
   0x3   :  { %v29_v2 = vmul.f32 %v26_v1, %v25_v0 }
   0x4   :  { %11 = vsyncpa [#allocation3], 0  ;;  %v315_v4 = vmov 0   ;;  %v28_v5 = vld [vmem:[%s478_s3] sm:$0x1]  ;;  %vm235_vm1 = vcmask 0  }
   0x5   :  { %v31_v3 = vsel %vm30_vm0, %v29_v2, 0.0  ;;  %257 = vset.pattern.permute.xlu0 %v315_v4  ;;  %258 = vset.pattern.permute.xlu1 %v315_v4  ;;  %v27_v9 = vld [vmem:[%s476_s1] sm:$0x1]  ;;  %v51_v12 = vld [vmem:[%s477_s2 + $0x1] sm:$0x1] }
   0x6   :  { %32 = vadd.xlane.f32.xlu0 %v31_v3  ;;  %v53_v16 = vld [vmem:[%s478_s3 + $0x1] sm:$0x1]  ;;  %v78_v23 = vld [vmem:[%s477_s2 + $0x2] sm:$0x1]  ;;  %v104_v34 = vld [vmem:[%s477_s2 + $0x3] sm:$0x1] }
   0x7   :  { %v52_v20 = vld [vmem:[%s476_s1 + $0x1] sm:$0x1]  ;;  %v80_v27 = vld [vmem:[%s478_s3 + $0x2] sm:$0x1]  ;;  %v106_v38 = vld [vmem:[%s478_s3 + $0x3] sm:$0x1] }
   0x8   :  { %v79_v31 = vld [vmem:[%s476_s1 + $0x2] sm:$0x1]  ;;  %v105_v42 = vld [vmem:[%s476_s1 + $0x3] sm:$0x1]  ;;  %v130_v45 = vld [vmem:[%s477_s2 + $0x4] sm:$0x1] }
   0x9   :  { %v132_v49 = vld [vmem:[%s478_s3 + $0x4] sm:$0x1]  ;;  %v156_v56 = vld [vmem:[%s477_s2 + $0x5] sm:$0x1]  ;;  %v182_v3 = vld [vmem:[%s477_s2 + $0x6] sm:$0x1] }
   0xa   :  { %v131_v53 = vld [vmem:[%s476_s1 + $0x4] sm:$0x1]  ;;  %v158_v60 = vld [vmem:[%s478_s3 + $0x5] sm:$0x1] }
  0x93   :  { %v33_v6 = vpop.xlane.xlu0 %32 }
  0x94   :  { %v34_v7 = vadd.f32 %v33_v6, %v28_v5  ;;  %v20_v6 = vld [vmem:[%s476_s1] sm:$0xff] }
  0x96   :  { %259 = vtanh.f32 %v34_v7  ;;  %v21_v7 = vld [vmem:[%s477_s2] sm:$0xff] }
  0xa0   :  { %v357_v8 = vpop.eup %259 }
  0xa1   :  { %38 = vperm.xlu0 %257, %v357_v8  }
 0x120   :  { %v39_v10 = vpop.permute.xlu0 %38 }
 0x121   :  { %v41_v11 = vmul.f32 %v39_v10, %v27_v9  ;;  %v22_v10 = vmul.f32 %v21_v7, %v20_v6 }
 0x123   :  { %v42_v13 = vadd.f32 %v41_v11, %v25_v0  ;;  %v157_v0 = vld [vmem:[%s476_s1 + $0x5] sm:$0x1]  ;;  %v184_v11 = vld [vmem:[%s478_s3 + $0x6] sm:$0x1] }
 0x125   :  { %v54_v14 = vmul.f32 %v51_v12, %v42_v13  ;;  %v43_v12 = vmul.f32 %v357_v8, %v357_v8 }
 0x127   :  { %v55_v15 = vsel %vm30_vm0, %v54_v14, 0.0 }
 0x128   :  { %56 = vadd.xlane.f32.xlu1 %v55_v15 }
 0x1b5   :  { %v57_v17 = vpop.xlane.xlu1 %56 }
 0x1b6   :  { %v58_v18 = vadd.f32 %v57_v17, %v53_v16 }
 0x1b8   :  { %261 = vtanh.f32 %v58_v18 }
 0x1c2   :  { %v370_v19 = vpop.eup %261 }
 0x1c3   :  { %62 = vperm.xlu1 %258, %v370_v19  }
 0x242   :  { %v63_v21 = vpop.permute.xlu1 %62 }
 0x243   :  { %v65_v22 = vmul.f32 %v63_v21, %v52_v20  ;;  %v44_v21 = vsub.f32 1.0, %v43_v12 }
 0x245   :  { %v66_v24 = vadd.f32 %v65_v22, %v42_v13  ;;  %v67_v13 = vmul.f32 %v370_v19, %v370_v19 }
 0x247   :  { %v81_v25 = vmul.f32 %v78_v23, %v66_v24  ;;  %v68_v22 = vsub.f32 1.0, %v67_v13 }
 0x249   :  { %v82_v26 = vsel %vm30_vm0, %v81_v25, 0.0 }
 0x24a   :  { %83 = vadd.xlane.f32.xlu1 %v82_v26 }
 0x2d7   :  { %v84_v28 = vpop.xlane.xlu1 %83 }
 0x2d8   :  { %v85_v29 = vadd.f32 %v84_v28, %v80_v27 }
 0x2da   :  { %263 = vtanh.f32 %v85_v29 }
 0x2e4   :  { %v264_v30 = vpop.eup %263 }
 0x2e5   :  { %89 = vperm.xlu0 %257, %v264_v30   ;;  %v94_v14 = vmul.f32 %v264_v30, %v264_v30 }
 0x2e7   :  { %v95_v23 = vsub.f32 1.0, %v94_v14  ;;  %v183_v14 = vld [vmem:[%s476_s1 + $0x6] sm:$0x1] }
 0x364   :  { %v90_v32 = vpop.permute.xlu0 %89 }
 0x365   :  { %v92_v33 = vmul.f32 %v90_v32, %v79_v31 }
 0x367   :  { %v93_v35 = vadd.f32 %v92_v33, %v66_v24 }
 0x369   :  { %v107_v36 = vmul.f32 %v104_v34, %v93_v35 }
 0x36b   :  { %v108_v37 = vsel %vm30_vm0, %v107_v36, 0.0 }
 0x36c   :  { %109 = vadd.xlane.f32.xlu0 %v108_v37 }
 0x3f9   :  { %v110_v39 = vpop.xlane.xlu0 %109 }
 0x3fa   :  { %v111_v40 = vadd.f32 %v110_v39, %v106_v38 }
 0x3fc   :  { %265 = vtanh.f32 %v111_v40 }
 0x406   :  { %v266_v41 = vpop.eup %265 }
 0x407   :  { %115 = vperm.xlu1 %258, %v266_v41   ;;  %v120_v15 = vmul.f32 %v266_v41, %v266_v41 }
 0x409   :  { %v121_v24 = vsub.f32 1.0, %v120_v15 }
 0x486   :  { %v116_v43 = vpop.permute.xlu1 %115 }
 0x487   :  { %v118_v44 = vmul.f32 %v116_v43, %v105_v42 }
 0x489   :  { %v119_v46 = vadd.f32 %v118_v44, %v93_v35 }
 0x48b   :  { %v133_v47 = vmul.f32 %v130_v45, %v119_v46 }
 0x48d   :  { %v134_v48 = vsel %vm30_vm0, %v133_v47, 0.0 }
 0x48e   :  { %135 = vadd.xlane.f32.xlu1 %v134_v48 }
 0x51b   :  { %v136_v50 = vpop.xlane.xlu1 %135 }
 0x51c   :  { %v137_v51 = vadd.f32 %v136_v50, %v132_v49 }
 0x51e   :  { %267 = vtanh.f32 %v137_v51 }
 0x528   :  { %v268_v52 = vpop.eup %267 }
 0x529   :  { %141 = vperm.xlu0 %257, %v268_v52   ;;  %v146_v18 = vmul.f32 %v268_v52, %v268_v52 }
 0x52b   :  { %v147_v28 = vsub.f32 1.0, %v146_v18 }
 0x5a8   :  { %v142_v54 = vpop.permute.xlu0 %141 }
 0x5a9   :  { %v144_v55 = vmul.f32 %v142_v54, %v131_v53 }
 0x5ab   :  { %v145_v57 = vadd.f32 %v144_v55, %v119_v46 }
 0x5ad   :  { %v159_v58 = vmul.f32 %v156_v56, %v145_v57 }
 0x5af   :  { %v160_v59 = vsel %vm30_vm0, %v159_v58, 0.0 }
 0x5b0   :  { %161 = vadd.xlane.f32.xlu0 %v160_v59 }
 0x63d   :  { %v162_v61 = vpop.xlane.xlu0 %161 }
 0x63e   :  { %v163_v62 = vadd.f32 %v162_v61, %v158_v60 }
 0x640   :  { %269 = vtanh.f32 %v163_v62 }
 0x64a   :  { %v270_v63 = vpop.eup %269 }
 0x64b   :  { %167 = vperm.xlu1 %258, %v270_v63   ;;  %v172_v20 = vmul.f32 %v270_v63, %v270_v63 }
 0x64d   :  { %v173_v29 = vsub.f32 1.0, %v172_v20 }
 0x6ca   :  { %v168_v1 = vpop.permute.xlu1 %167 }
 0x6cb   :  { %v170_v2 = vmul.f32 %v168_v1, %v157_v0 }
 0x6cd   :  { %v419_v4 = vadd.f32 %v170_v2, %v145_v57 }
 0x6cf   :  { %v185_v5 = vmul.f32 %v182_v3, %v419_v4 }
 0x6d1   :  { %v186_v9 = vsel %vm30_vm0, %v185_v5, 0.0 }
 0x6d2   :  { %187 = vadd.xlane.f32.xlu1 %v186_v9 }
 0x6d6   :  { %23 = vadd.xlane.f32.xlu1 %v22_v10 }
 0x75f   :  { %v188_v16 = vpop.xlane.xlu1 %187 }
 0x760   :  { %v189_v17 = vadd.f32 %v188_v16, %v184_v11 }
 0x762   :  { %271 = vtanh.f32 %v189_v17  ;;  %v208_v17 = vld [vmem:[%s477_s2 + $0x7] sm:$0x1]  ;;  %s316_s2 = smov [#allocation2]  }
 0x763   :  { %v436_v25 = vpop.xlane.xlu1 %23  ;;  %s245_s18 = sshll.u32 %s316_s2, 4  ;;  %s246_s18 = int_to_ptr.vmem [resolvable:$true] %s245_s18 }
 0x764   :  { %v45_v26 = vmul.f32 %v44_v21, %v436_v25  ;;  %v70_v8 = vrot.slane %v436_v25, 1  ;;  %v96_v27 = vrot.slane %v436_v25, 2  ;;  %v122_v19 = vrot.slane %v436_v25, 3  ;;  %s295_s19 = scalar_lea.vmem %s246_s18, 32  ;;  %p296_p1 = scmp.lt.s32.totalorder %s246_s18, %s246_s18 }
 0x765   :  { %v148_v30 = vrot.slane %v436_v25, 4  ;;  %v174_v31 = vrot.slane %v436_v25, 5  ;;  %v200_v50 = vrot.slane %v436_v25, 6 }
 0x766   :  { %v46_v32 = vadd.f32 1.0, %v45_v26  ;;  %v72_v33 = vmul.f32 %v70_v8, %v68_v22  ;;  %v98_v34 = vmul.f32 %v96_v27, %v95_v23  ;;  %v124_v35 = vmul.f32 %v122_v19, %v121_v24  ;;  %v210_v22 = vld [vmem:[%s478_s3 + $0x7] sm:$0x1]  ;;  %s291_s3 = scalar_lea.vmem %s246_s18, 16 }
 0x767   :  { %v150_v36 = vmul.f32 %v148_v30, %v147_v28  ;;  %v176_v37 = vmul.f32 %v174_v31, %v173_v29  ;;  %v226_v27 = vrot.slane %v436_v25, 7  ;;  %p292_p0 = scmp.ne.s32.totalorder %s246_s18, %s291_s3  ;;  %p297_p2 = scmp.lt.s32.totalorder %s295_s19, %s291_s3 }
 0x768   :  { %v47_v38 = vand.u32 2147483647, %v46_v32  ;;  %v73_v39 = vadd.f32 1.0, %v72_v33  ;;  %v99_v40 = vadd.f32 1.0, %v98_v34  ;;  %v125_v41 = vadd.f32 1.0, %v124_v35 }
 0x769   :  { %v151_v42 = vadd.f32 1.0, %v150_v36  ;;  %v177_v43 = vadd.f32 1.0, %v176_v37  ;;  %p298_p3 = por %p297_p2, %p296_p1 }
 0x76a   :  { %273 = vlog2.f32 %v47_v38  ;;  %v74_v44 = vand.u32 2147483647, %v73_v39  ;;  %v100_v45 = vand.u32 2147483647, %v99_v40  ;;  %v126_v46 = vand.u32 2147483647, %v125_v41 }
 0x76b   :  { %v152_v48 = vand.u32 2147483647, %v151_v42  ;;  %v178_v51 = vand.u32 2147483647, %v177_v43  ;;  %p299_p4 = pnand %p298_p3, %p292_p0 }
 0x76c   :  { %v272_v47 = vpop.eup %271  ;;  %275 = vlog2.f32 %v74_v44 }
 0x76d   :  { %v198_v49 = vmul.f32 %v272_v47, %v272_v47  ;;  %193 = vperm.xlu0 %257, %v272_v47   ;;  %277 = vlog2.f32 %v100_v45 }
 0x76e   :  { %279 = vlog2.f32 %v126_v46 }
 0x76f   :  { %v199_v52 = vsub.f32 1.0, %v198_v49  ;;  %281 = vlog2.f32 %v152_v48 }
 0x770   :  { %283 = vlog2.f32 %v178_v51 }
 0x771   :  { %v202_v53 = vmul.f32 %v200_v50, %v199_v52 }
 0x773   :  { %v203_v54 = vadd.f32 1.0, %v202_v53 }
 0x774   :  { %v274_v55 = vpop.eup %273 }
 0x775   :  { %v204_v56 = vand.u32 2147483647, %v203_v54  ;;  %v49_v59 = vmul.f32 0.6931472, %v274_v55 }
 0x776   :  { %v276_v57 = vpop.eup %275 }
 0x777   :  { %v278_v58 = vpop.eup %277  ;;  %v76_v60 = vmul.f32 0.6931472, %v276_v57  ;;  %285 = vlog2.f32 %v204_v56 }
 0x778   :  { %v280_v61 = vpop.eup %279  ;;  %v102_v63 = vmul.f32 0.6931472, %v278_v58 }
 0x779   :  { %v77_v62 = vadd.f32 %v76_v60, %v49_v59  ;;  %v282_v0 = vpop.eup %281  ;;  %v128_v2 = vmul.f32 0.6931472, %v280_v61 }
 0x77a   :  { %v284_v3 = vpop.eup %283  ;;  %v154_v6 = vmul.f32 0.6931472, %v282_v0 }
 0x77b   :  { %v103_v1 = vadd.f32 %v102_v63, %v77_v62  ;;  %v180_v9 = vmul.f32 0.6931472, %v284_v3 }
 0x77d   :  { %v129_v5 = vadd.f32 %v128_v2, %v103_v1 }
 0x77f   :  { %v155_v7 = vadd.f32 %v154_v6, %v129_v5 }
 0x781   :  { %v286_v10 = vpop.eup %285  ;;  %v181_v11 = vadd.f32 %v180_v9, %v155_v7 }
 0x782   :  { %v206_v12 = vmul.f32 0.6931472, %v286_v10 }
 0x784   :  { %v207_v13 = vadd.f32 %v206_v12, %v181_v11 }
 0x7ec   :  { %v194_v15 = vpop.permute.xlu0 %193 }
 0x7ed   :  { %v196_v16 = vmul.f32 %v194_v15, %v183_v14 }
 0x7ef   :  { %v197_v18 = vadd.f32 %v196_v16, %v419_v4 }
 0x7f1   :  { %v211_v20 = vmul.f32 %v208_v17, %v197_v18 }
 0x7f3   :  { %v212_v21 = vsel %vm30_vm0, %v211_v20, 0.0 }
 0x7f4   :  { %213 = vadd.xlane.f32.xlu0 %v212_v21 }
 0x881   :  { %v214_v23 = vpop.xlane.xlu0 %213 }
 0x882   :  { %v215_v24 = vadd.f32 %v214_v23, %v210_v22 }
 0x884   :  { %287 = vtanh.f32 %v215_v24 }
 0x88e   :  { %v288_v26 = vpop.eup %287 }
 0x88f   :  { %v224_v8 = vmul.f32 %v288_v26, %v288_v26  ;;  %219 = vperm.xlu1 %258, %v288_v26  }
 0x891   :  { %v225_v19 = vsub.f32 1.0, %v224_v8 }
 0x893   :  { %v228_v28 = vmul.f32 %v226_v27, %v225_v19 }
 0x895   :  { %v229_v29 = vadd.f32 1.0, %v228_v28 }
 0x897   :  { %v230_v4 = vand.u32 2147483647, %v229_v29 }
 0x899   :  { %289 = vlog2.f32 %v230_v4 }
 0x8a3   :  { %v290_v30 = vpop.eup %289 }
 0x8a4   :  { %v232_v31 = vmul.f32 0.6931472, %v290_v30 }
 0x8a6   :  { %v233_v32 = vadd.f32 %v232_v31, %v207_v13 }
 0x8a8   :  { %236 = vst.msk [vmem:[#allocation2] sm:$0x1] %vm235_vm1, %v233_v32 }
 0x8a9   :  { %302 = shalt.err (!%p299_p4)
}
 0x8aa   :  { %s303_s22 = scalar_lea.hbm %s480_s5, 16 }
 0x8ab   :  { %p304_p5 = scmp.ne.s32.totalorder %s480_s5, %s303_s22  ;;  %p307_p6 = scmp.lt.u32.totalorder %s303_s22, %s480_s5 }
 0x8ad   :  { %p309_p7 = pnand %p307_p6, %p304_p5 }
 0x8af   :  { %312 = shalt.err (!%p309_p7)
}
 0x8b0   :  { %248 = dma.vmem_to_hbm [thread:$0]  %s246_s18, 16, %s480_s5, [#allocation3]   ;;  %v209_v25 = vld [vmem:[%s476_s1 + $0x7] sm:$0x1] }
 0x90e   :  { %v220_v33 = vpop.permute.xlu1 %219 }
 0x90f   :  { %v222_v34 = vmul.f32 %v220_v33, %v209_v25 }
 0x911   :  { %v223_v35 = vadd.f32 %v222_v34, %v197_v18 }
 0x913   :  { %234 = vst [vmem:[%s479_s4] sm:$0x1] %v223_v35 }
 0x914   :  { %313 = dma.done.wait [#allocation3], 16  }
 0x915   :  { %314 = vsyncadd [#allocation3], 4294967280 }
 0x916   :  { %254 = vsyncpa [#allocation3], 1 }

</bundles_post_ra>
